<compile_context>
chip_gen: v5e
topology: v5e:2x2
jax: 0.10.0
libtpu: 0.0.40
codegen_flags: <defaults>
</compile_context>

<pallas_src>
import functools
import math

import jax
import jax.numpy as jnp
from jax.experimental import pallas as pl
from jax.experimental.pallas import tpu as pltpu

SQRT2 = math.sqrt(2.0)
NEG_SLOPE = 0.2

G_CHANNEL_CONFIG = {4: 4096, 8: 2048, 16: 1024, 32: 512, 64: 256,
                    128: 128, 256: 64, 512: 32, 1024: 16}

# Separable [1, 3, 3, 1]/8 FIR scaled by sqrt(4) per axis (upfirdn kernel * 4).
_SEP_BLUR = (0.25, 0.75, 0.75, 0.25)

_VMEM_LIMIT = 64 * 1024 * 1024   # compiler cap; actual per-step usage << this
_MAX_ROW_TILE = 16               # 16 rows x full width keeps the working set
                                 # <~20 MiB even at 1024x1024 activations.


def _pick_row_tile(h_out):
    return h_out if h_out <= _MAX_ROW_TILE else _MAX_ROW_TILE


# ---------------------------------------------------------------------------
# Tiny "style path" kernels: PixelNorm, EqualLinear, demodulation vector.
# ---------------------------------------------------------------------------

def _pixelnorm_kernel(x_ref, o_ref):
    x = x_ref[...]
    ms = jnp.mean(x * x, axis=-1, keepdims=True)
    o_ref[...] = x * jax.lax.rsqrt(ms + 1e-8)


def pixel_norm(x):
    return pl.pallas_call(
        _pixelnorm_kernel,
        out_shape=jax.ShapeDtypeStruct(x.shape, x.dtype),
    )(x)


def _linear_kernel(x_ref, w_ref, b_ref, o_ref, *, activate):
    # EqualLinear with scale/lr_mul pre-folded into w/b at parameter setup.
    out = jnp.dot(x_ref[...], w_ref[...],
                  preferred_element_type=jnp.float32) + b_ref[...]
    if activate:
        out = jnp.where(out >= 0.0, out, NEG_SLOPE * out) * SQRT2
    o_ref[...] = out


def equal_linear(x, w, b, *, activate):
    return pl.pallas_call(
        functools.partial(_linear_kernel, activate=activate),
        out_shape=jax.ShapeDtypeStruct((x.shape[0], w.shape[1]), jnp.float32),
    )(x, w, b)


def _demod_kernel(s_ref, wsq_ref, d_ref):
    # d[b, oc] = rsqrt(sum_{tap, ic} (scale*w*s)^2 + eps) = rsqrt(s^2 @ wsq + eps)
    s = s_ref[...]
    d_ref[...] = jax.lax.rsqrt(
        jnp.dot(s * s, wsq_ref[...], preferred_element_type=jnp.float32) + 1e-8)


def demod_scale(s, wsq):
    return pl.pallas_call(
        _demod_kernel,
        out_shape=jax.ShapeDtypeStruct((s.shape[0], wsq.shape[1]), jnp.float32),
    )(s, wsq)


# ---------------------------------------------------------------------------
# Modulated 3x3 conv: shared bf16 weight, per-sample style scaling of the
# input slab, per-sample demod scaling of the output, optional fused
# noise + bias + leaky-ReLU epilogue.  Everything is flattened to
# (rows = y*Wp + x, channels) so only contiguous sublane slices are used.
# ---------------------------------------------------------------------------

def _mod_conv_kernel(*refs, k, wp, th, fuse_act):
    if fuse_act:
        s_ref, d_ref, noise_ref, bias_ref, w_ref, x_hbm, o_ref, xbuf, sem = refs
    else:
        s_ref, d_ref, w_ref, x_hbm, o_ref, xbuf, sem = refs
        noise_ref = bias_ref = None

    b = pl.program_id(0)
    rt = pl.program_id(1)
    ct = pl.program_id(2)
    m = th * wp

    # Refill the halo'd row slab only on the first Cout tile of this (b, rt):
    # the Cout axis is innermost and "arbitrary", so the slab persists in the
    # scratch across the Cout sweep.
    @pl.when(ct == 0)
    def _():
        cp = pltpu.make_async_copy(
            x_hbm.at[b, pl.ds(rt * m, xbuf.shape[0])], xbuf, sem.at[0])
        cp.start()
        cp.wait()

    # Modulate: scale the whole slab by the per-sample style (lane-aligned),
    # then feed the MXU in bf16.
    xm = (xbuf[...].astype(jnp.float32) * s_ref[0, 0]).astype(jnp.bfloat16)

    tc = o_ref.shape[-1]
    acc = None
    for ky in range(k):
        for kx in range(k):
            off = ky * wp + kx
            t = jnp.dot(xm[off:off + m], w_ref[ky * k + kx],
                        preferred_element_type=jnp.float32)
            acc = t if acc is None else acc + t

    out = acc * d_ref[0, 0]                                   # demodulate
    if fuse_act:
        out = out + noise_ref[0, 0][:, None] + bias_ref[0, 0]
        out = jnp.where(out >= 0.0, out, NEG_SLOPE * out) * SQRT2
    o_ref[0] = out.astype(o_ref.dtype)


def modulated_conv(xpad, s, d, w_taps, *, k, h_out, out_dtype,
                   noise=None, bias=None, fuse_act=False):
    """xpad: (B, Hp, Wp, Cin) padded input; returns (B, h_out, Wp-k+1, Cout)."""
    b, hp, wp, cin = xpad.shape
    w_out = wp - (k - 1)
    cout = w_taps.shape[-1]
    tc = cout if (cout <= 128 or cout % 128 != 0) else 128

    th = _pick_row_tile(h_out)
    n_rt = -(-h_out // th)
    h_alloc = n_rt * th
    hp_needed = h_alloc + k               # +1 extra row covers the flat-slab tail
    if hp < hp_needed:
        xpad = jnp.pad(xpad, ((0, 0), (0, hp_needed - hp), (0, 0), (0, 0)))
    x_flat = xpad.reshape(b, -1, cin)

    m = th * wp
    slab_len = (th + k - 1) * wp + (k - 1)

    in_specs = [
        pl.BlockSpec((1, 1, cin), lambda bi, ri, ci: (bi, 0, 0)),   # style s
        pl.BlockSpec((1, 1, tc), lambda bi, ri, ci: (bi, 0, ci)),   # demod d
    ]
    args = [s.reshape(b, 1, cin), d.reshape(b, 1, cout)]
    if fuse_act:
        assert h_alloc == h_out
        noise_p = jnp.pad(noise, ((0, 0), (0, 0), (0, wp - noise.shape[2])))
        noise_f = noise_p.reshape(n_rt, 1, m)
        in_specs += [
            pl.BlockSpec((1, 1, m), lambda bi, ri, ci: (ri, 0, 0)),   # noise
            pl.BlockSpec((1, 1, tc), lambda bi, ri, ci: (0, 0, ci)),  # act bias
        ]
        args += [noise_f, bias]
    in_specs += [
        pl.BlockSpec((k * k, cin, tc), lambda bi, ri, ci: (0, 0, ci)),  # weight
        pl.BlockSpec(memory_space=pl.ANY),                              # x (HBM)
    ]
    args += [w_taps, x_flat]

    out = pl.pallas_call(
        functools.partial(_mod_conv_kernel, k=k, wp=wp, th=th, fuse_act=fuse_act),
        out_shape=jax.ShapeDtypeStruct((b, h_alloc * wp, cout), out_dtype),
        grid=(b, n_rt, cout // tc),
        in_specs=in_specs,
        out_specs=pl.BlockSpec((1, m, tc), lambda bi, ri, ci: (bi, ri, ci)),
        scratch_shapes=[pltpu.VMEM((slab_len, cin), xpad.dtype),
                        pltpu.SemaphoreType.DMA((1,))],
        compiler_params=pltpu.CompilerParams(
            dimension_semantics=("parallel", "parallel", "arbitrary"),
            vmem_limit_bytes=_VMEM_LIMIT),
    )(*args)

    out = out.reshape(b, h_alloc, wp, cout)
    return out[:, :h_out, :w_out, :]


# ---------------------------------------------------------------------------
# Separable 4x4 upfirdn blur (always the x4-scaled upsample FIR), spatially
# tiled with a manually DMA'd halo slab, optional fused noise+bias+lrelu.
# ---------------------------------------------------------------------------

def _blur_kernel(*refs, th, wz, ksz, kv, fuse_act):
    if fuse_act:
        noise_ref, bias_ref, z_hbm, o_ref, zbuf, sem = refs
    else:
        z_hbm, o_ref, zbuf, sem = refs
        noise_ref = bias_ref = None

    b = pl.program_id(0)
    rt = pl.program_id(1)
    m = th * wz

    cp = pltpu.make_async_copy(
        z_hbm.at[b, pl.ds(rt * m, zbuf.shape[0])], zbuf, sem.at[0])
    cp.start()
    cp.wait()

    z = zbuf[...].astype(jnp.float32)
    hlen = (th + ksz - 1) * wz
    # horizontal pass (4 taps)
    h_acc = z[0:hlen] * kv[0]
    for kx in range(1, ksz):
        h_acc = h_acc + z[kx:kx + hlen] * kv[kx]
    # vertical pass (4 taps)
    out = h_acc[0:m] * kv[0]
    for ky in range(1, ksz):
        out = out + h_acc[ky * wz:ky * wz + m] * kv[ky]

    if fuse_act:
        out = out + noise_ref[0, 0][:, None] + bias_ref[0, 0]
        out = jnp.where(out >= 0.0, out, NEG_SLOPE * out) * SQRT2
    o_ref[0] = out.astype(o_ref.dtype)


def blur_upfirdn(zpad, *, h_out, out_dtype, noise=None, bias=None,
                 fuse_act=False):
    """zpad: (B, h_out+3, Wz, C) pre-padded input; 'valid' 4x4 x4-scaled FIR."""
    b, hz, wz, c = zpad.shape
    ksz = 4
    w_out = wz - (ksz - 1)

    th = _pick_row_tile(h_out)
    assert h_out % th == 0
    n_rt = h_out // th
    m = th * wz

    hz_needed = h_out + ksz               # one extra zero row for the flat tail
    if hz < hz_needed:
        zpad = jnp.pad(zpad, ((0, 0), (0, hz_needed - hz), (0, 0), (0, 0)))
    z_flat = zpad.reshape(b, -1, c)

    in_specs, args = [], []
    if fuse_act:
        noise_p = jnp.pad(noise, ((0, 0), (0, 0), (0, wz - noise.shape[2])))
        noise_f = noise_p.reshape(n_rt, 1, m)
        in_specs += [pl.BlockSpec((1, 1, m), lambda bi, ri: (ri, 0, 0)),
                     pl.BlockSpec((1, 1, c), lambda bi, ri: (0, 0, 0))]
        args += [noise_f, bias]
    in_specs += [pl.BlockSpec(memory_space=pl.ANY)]
    args += [z_flat]

    out = pl.pallas_call(
        functools.partial(_blur_kernel, th=th, wz=wz, ksz=ksz, kv=_SEP_BLUR,
                          fuse_act=fuse_act),
        out_shape=jax.ShapeDtypeStruct((b, h_out * wz, c), out_dtype),
        grid=(b, n_rt),
        in_specs=in_specs,
        out_specs=pl.BlockSpec((1, m, c), lambda bi, ri: (bi, ri, 0)),
        scratch_shapes=[pltpu.VMEM(((th + ksz - 1) * wz + ksz - 1, c),
                                   zpad.dtype),
                        pltpu.SemaphoreType.DMA((1,))],
        compiler_params=pltpu.CompilerParams(
            dimension_semantics=("parallel", "parallel"),
            vmem_limit_bytes=_VMEM_LIMIT),
    )(*args)

    return out.reshape(b, h_out, wz, c)[:, :, :w_out, :]


# ---------------------------------------------------------------------------
# ToRGB: modulated 1x1 conv (no demodulation) with fused bias + skip add.
# ---------------------------------------------------------------------------

def _to_rgb_kernel(*refs, has_skip):
    if has_skip:
        s_ref, w_ref, b_ref, x_ref, skip_ref, o_ref = refs
    else:
        s_ref, w_ref, b_ref, x_ref, o_ref = refs
        skip_ref = None
    xm = (x_ref[0].astype(jnp.float32) * s_ref[0, 0]).astype(jnp.bfloat16)
    out = jnp.dot(xm, w_ref[...], preferred_element_type=jnp.float32)
    out = out + b_ref[0, 0]
    if has_skip:
        out = out + skip_ref[0]
    o_ref[0] = out


def to_rgb_conv(x, s, w_rgb, bias, skip_up):
    b, h, wdim, cin = x.shape
    th = _pick_row_tile(h)
    n_rt = h // th
    m = th * wdim
    x_flat = x.reshape(b, h * wdim, cin)
    has_skip = skip_up is not None

    in_specs = [pl.BlockSpec((1, 1, cin), lambda bi, ri: (bi, 0, 0)),
                pl.BlockSpec((cin, 3), lambda bi, ri: (0, 0)),
                pl.BlockSpec((1, 1, 3), lambda bi, ri: (0, 0, 0)),
                pl.BlockSpec((1, m, cin), lambda bi, ri: (bi, ri, 0))]
    args = [s.reshape(b, 1, cin), w_rgb, bias, x_flat]
    if has_skip:
        in_specs.append(pl.BlockSpec((1, m, 3), lambda bi, ri: (bi, ri, 0)))
        args.append(skip_up.reshape(b, h * wdim, 3))

    out = pl.pallas_call(
        functools.partial(_to_rgb_kernel, has_skip=has_skip),
        out_shape=jax.ShapeDtypeStruct((b, h * wdim, 3), jnp.float32),
        grid=(b, n_rt),
        in_specs=in_specs,
        out_specs=pl.BlockSpec((1, m, 3), lambda bi, ri: (bi, ri, 0)),
        compiler_params=pltpu.CompilerParams(
            dimension_semantics=("parallel", "parallel"),
            vmem_limit_bytes=_VMEM_LIMIT),
    )(*args)
    return out.reshape(b, h, wdim, 3)


# ---------------------------------------------------------------------------
# Layer wrappers (JAX glue: padding / zero-dilation only).
# ---------------------------------------------------------------------------

def styled_conv(x, w_style, p, *, upsample):
    b, h, wdim, cin = x.shape
    s = equal_linear(w_style, p["mod"]["w"], p["mod"]["b"], activate=False)
    d = demod_scale(s, p["wsq"])
    noise = p["noise_w"] * p["noise_const"]        # (1, res, res)
    bias = p["act_b"]                              # (1, 1, cout)
    if upsample:
        # conv_transpose2d(stride=2) == zero-dilate, pad k-1, correlate with
        # the pre-flipped weight; then Blur(kernel*4, pad=(1,1)).
        xd = jnp.zeros((b, 2 * h - 1, 2 * wdim - 1, cin), x.dtype)
        xd = xd.at[:, ::2, ::2, :].set(x)
        xpad = jnp.pad(xd, ((0, 0), (2, 2), (2, 2), (0, 0)))
        out_t = modulated_conv(xpad, s, d, p["w_taps"], k=3, h_out=2 * h + 1,
                               out_dtype=jnp.bfloat16, fuse_act=False)
        zpad = jnp.pad(out_t, ((0, 0), (1, 1), (1, 1), (0, 0)))
        out = blur_upfirdn(zpad, h_out=2 * h, out_dtype=jnp.bfloat16,
                           noise=noise, bias=bias, fuse_act=True)
    else:
        xpad = jnp.pad(x, ((0, 0), (1, 1), (1, 1), (0, 0)))
        out = modulated_conv(xpad, s, d, p["w_taps"], k=3, h_out=h,
                             out_dtype=jnp.bfloat16,
                             noise=noise, bias=bias, fuse_act=True)
    return out


def to_rgb(x, w_style, p, skip):
    s = equal_linear(w_style, p["mod"]["w"], p["mod"]["b"], activate=False)
    skip_up = None
    if skip is not None:
        # Upsample(blur_kernel): upfirdn2d(up=2, pad=(2,1), kernel*4).
        bs, hs, ws_, _ = skip.shape
        sd_ = jnp.zeros((bs, 2 * hs, 2 * ws_, 3), skip.dtype)
        sd_ = sd_.at[:, ::2, ::2, :].set(skip)
        sp = jnp.pad(sd_, ((0, 0), (2, 1), (2, 1), (0, 0)))
        skip_up = blur_upfirdn(sp, h_out=2 * hs, out_dtype=jnp.float32,
                               fuse_act=False)
    return to_rgb_conv(x, s, p["w"], p["bias"], skip_up)


def style_mlp(z, params):
    x = pixel_norm(z)
    for lp in params["style"]:
        x = equal_linear(x, lp["w"], lp["b"], activate=True)
    return x


def generator_forward(params, styles_z):
    """Generator.forward(z, input_is_style=False, truncation=1.0,
    randomize_noise=False) -> final RGB image, NCHW."""
    b, n_in, dim = styles_z.shape
    assert n_in == 1
    w = style_mlp(styles_z.reshape(-1, dim), params)
    w = jnp.tile(w[:, None, :], (1, params["n_style"], 1))

    x = jnp.tile(params["const"], (b, 1, 1, 1)).astype(jnp.bfloat16)
    x = styled_conv(x, w[:, 0], params["conv1"], upsample=False)
    skip = to_rgb(x, w[:, 1], params["to_rgb1"], None)
    i = 1
    for layer in range(len(params["to_rgbs"])):
        x = styled_conv(x, w[:, i], params["convs"][2 * layer], upsample=True)
        x = styled_conv(x, w[:, i + 1], params["convs"][2 * layer + 1],
                        upsample=False)
        skip = to_rgb(x, w[:, i + 2], params["to_rgbs"][layer], skip)
        i += 2
    return jnp.transpose(skip, (0, 3, 1, 2))                  # NCHW


# ---------------------------------------------------------------------------
# Parameter setup (constant scales / flips pre-folded, conv weights in bf16).
# ---------------------------------------------------------------------------

def init_generator_params(key, *, resolution, style_dim, n_mlp,
                          channel_multiplier, channel_max, lr_mlp=0.01):
    channels = {k: min(channel_max, int(v * channel_multiplier))
                for k, v in G_CHANNEL_CONFIG.items()}
    log_res = int(math.log2(resolution))
    n_style = log_res * 2 - 2
    keys = iter(jax.random.split(key, 1024))
    nk = lambda: next(keys)

    def eq_linear_p(din, dout, bias_init, lr_mul):
        # torch: weight = randn(out,in)/lr_mul, runtime scale = lr_mul/sqrt(in),
        # bias scaled by lr_mul -- folded here once.
        w = jax.random.normal(nk(), (din, dout), jnp.float32) / lr_mul
        return {"w": w * ((1.0 / math.sqrt(din)) * lr_mul),
                "b": jnp.full((1, dout), float(bias_init) * lr_mul, jnp.float32)}

    def conv_p(cin, cout, res, upsample):
        w = jax.random.normal(nk(), (3, 3, cin, cout), jnp.float32)
        w = w * (1.0 / math.sqrt(cin * 9))            # StyleGAN2 weight scale
        wsq = jnp.sum(w * w, axis=(0, 1))             # (cin, cout) for demod
        if upsample:
            w = w[::-1, ::-1]                         # conv_transpose == corr w/ flipped taps
        return {"mod": eq_linear_p(style_dim, cin, 1.0, 1.0),
                "w_taps": w.reshape(9, cin, cout).astype(jnp.bfloat16),
                "wsq": wsq,
                "noise_w": jnp.zeros((), jnp.float32),   # torch zero-inits NoiseInjection
                "noise_const": jax.random.normal(nk(), (1, res, res), jnp.float32),
                "act_b": jnp.zeros((1, 1, cout), jnp.float32)}

    def rgb_p(cin):
        w = jax.random.normal(nk(), (cin, 3), jnp.float32) * (1.0 / math.sqrt(cin))
        return {"mod": eq_linear_p(style_dim, cin, 1.0, 1.0),
                "w": w.astype(jnp.bfloat16),
                "bias": jnp.zeros((1, 1, 3), jnp.float32)}

    params = {
        "style_dim": style_dim,
        "n_style": n_style,
        "style": [eq_linear_p(style_dim, style_dim, 0.0, lr_mlp)
                  for _ in range(n_mlp)],
        "const": jax.random.normal(nk(), (1, 4, 4, channels[4]), jnp.float32),
        "conv1": conv_p(channels[4], channels[4], 4, False),
        "to_rgb1": rgb_p(channels[4]),
        "convs": [],
        "to_rgbs": [],
    }
    in_ch = channels[4]
    for i in range(3, log_res + 1):
        out_ch = channels[2 ** i]
        res = 2 ** i
        params["convs"].append(conv_p(in_ch, out_ch, res, True))    # upsample
        params["convs"].append(conv_p(out_ch, out_ch, res, False))  # regular
        params["to_rgbs"].append(rgb_p(out_ch))
        in_ch = out_ch
    return params


# --------------------------------- main -------------------------------------

if __name__ == "__main__":
    key = jax.random.PRNGKey(0)
    pkey, zkey = jax.random.split(key)
    # Small generator: resolution=32 so the 16-row spatial tiling (including
    # the odd-height transposed-conv outputs) is actually exercised.
    params = init_generator_params(pkey, resolution=32, style_dim=32, n_mlp=4,
                                   channel_multiplier=2, channel_max=16)
    z = jax.random.normal(zkey, (2, 1, 32), jnp.float32)   # (B, 1, style_dim)
    img = generator_forward(params, z)
    img = jax.block_until_ready(img)
    assert img.shape == (2, 3, 32, 32), img.shape
    assert bool(jnp.all(jnp.isfinite(img)))
    print("KERNEL_OK")
</pallas_src>

<mosaic_0001>
module attributes {stable_mosaic.version = 11 : i64} {
  func.func @_pixelnorm_kernel(%arg0: memref<2x32xf32, #tpu.memory_space<vmem>>, %arg1: memref<2x32xf32, #tpu.memory_space<vmem>>) attributes {dimension_semantics = [], scalar_prefetch = 0 : i64, scratch_operands = 0 : i64, tpu.core_type = #tpu.core_type<tc>} {
    %c0 = arith.constant 0 : index
    %c0_0 = arith.constant 0 : index
    %0 = vector.load %arg0[%c0, %c0_0] : memref<2x32xf32, #tpu.memory_space<vmem>>, vector<2x32xf32>
    %1 = arith.mulf %0, %0 : vector<2x32xf32>
    %cst = arith.constant dense<0.000000e+00> : vector<2xf32>
    %2 = vector.multi_reduction <add>, %1, %cst [1] : vector<2x32xf32> to vector<2xf32>
    %3 = vector.shape_cast %2 : vector<2xf32> to vector<2x1xf32>
    %cst_1 = arith.constant 3.200000e+01 : f32
    %4 = vector.broadcast %cst_1 : f32 to vector<2x1xf32>
    %5 = arith.divf %3, %4 : vector<2x1xf32>
    %cst_2 = arith.constant 9.99999993E-9 : f32
    %6 = vector.broadcast %cst_2 : f32 to vector<2x1xf32>
    %7 = arith.addf %5, %6 : vector<2x1xf32>
    %8 = math.rsqrt %7 : vector<2x1xf32>
    %9 = vector.broadcast %8 : vector<2x1xf32> to vector<2x32xf32>
    %10 = arith.mulf %0, %9 : vector<2x32xf32>
    %c0_3 = arith.constant 0 : index
    %c0_4 = arith.constant 0 : index
    %11 = vector.load %arg1[%c0_3, %c0_4] : memref<2x32xf32, #tpu.memory_space<vmem>>, vector<2x32xf32>
    tpu.vector_store %arg1[%c0_3, %c0_4], %10 {strides = array<i32>} : memref<2x32xf32, #tpu.memory_space<vmem>>, vector<2x32xf32>,
    return
  }
}

</mosaic_0001>

<bundles_post_ra>
// kernel: tpu_custom_call.1
= control target key start
LH: loop header
LB: loop body
LE: loop exit
PB: predicated region body
PF: predicated region fallthrough
CT: control target
= control target key end

     0   :  { %6 = vsyncpa [#allocation3], 0  ;;  %s147_s0 = inlined_call_operand.hbm [shape: f32[2,32], index: 0, kind: input, shape index: {}]   ;;  %s148_s1 = inlined_call_operand.hbm [shape: f32[2,32], index: 1, kind: output, shape index: {}]  }
   0x1   :  { %7 = vsyncpa [#allocation4], 0  ;;  %s13_s8 = sshll.u32 %s147_s0, 4  ;;  %s126_s9 = smov [#allocation2]   ;;  %s14_s8 = int_to_ptr.hbm [resolvable:$true] %s13_s8 }
   0x2   :  { %s15_s10 = sshll.u32 %s126_s9, 4  ;;  %s16_s10 = int_to_ptr.vmem [resolvable:$true] %s15_s10 }
   0x3   :  { %18 = dma.hbm_to_vmem [thread:$0]  %s14_s8, 32, %s16_s10, [#allocation3]  }
   0x4   :  { %122 = dma.done.wait [#allocation3], 32  }
   0x5   :  { %123 = vsyncadd [#allocation3], 4294967264  ;;  %v23_v0 = vld [vmem:[#allocation2] sm:$0x3]  ;;  %vm25_vm0 = vcmask 254976   ;;  %v127_v3 = vmov 32.0  }
   0x6   :  { %v24_v1 = vmul.f32 %v23_v0, %v23_v0  ;;  %70 = vrcp.f32 %v127_v3  ;;  %s128_s0 = smov [#allocation5]   ;;  %s57_s14 = sshll.u32 %s148_s1, 4  ;;  %s58_s14 = int_to_ptr.hbm [resolvable:$true] %s57_s14 }
   0x7   :  { %s55_s11 = sshll.u32 %s128_s0, 4  ;;  %s56_s11 = int_to_ptr.vmem [resolvable:$true] %s55_s11 }
   0x8   :  { %v26_v2 = vsel %vm25_vm0, %v24_v1, 0.0 }
   0x9   :  { %27 = vadd.xlane.f32.xlu0 %v26_v2 }
   0xc   :  { %v71_v4 = vpop.eup %70 }
   0xd   :  { %v30_v5 = vmul.f32 32.0, %v71_v4  ;;  %vm34_vm1 = vweird.f32 %v71_v4 }
   0xf   :  { %v31_v6 = vsub.f32 1.0, %v30_v5 }
  0x11   :  { %v32_v7 = vmul.f32 %v71_v4, %v31_v6 }
  0x13   :  { %v33_v8 = vadd.f32 %v71_v4, %v32_v7 }
  0x15   :  { %v35_v9 = vsel %vm34_vm1, %v71_v4, %v33_v8 }
  0x7c   :  { %v28_v10 = vpop.xlane.xlu0 %27 }
  0x7d   :  { %v36_v11 = vmul.f32 %v35_v9, %v28_v10 }
  0x7f   :  { %v37_v12 = vadd.f32 1e-08, %v36_v11 }
  0x81   :  { %72 = vrsqrt.f32 %v37_v12  ;;  %vm44_vm3 = vweird.f32 %v37_v12 }
  0x87   :  { %v73_v13 = vpop.eup %72 }
  0x88   :  { %v39_v14 = vmul.f32 %v73_v13, %v37_v12  ;;  %vm45_vm2 = vweird.f32 %v73_v13 }
  0x89   :  { %vm46_vm4 = vmor %vm44_vm3, %vm45_vm2 }
  0x8a   :  { %v40_v15 = vmul.f32 %v73_v13, %v39_v14 }
  0x8c   :  { %v41_v16 = vmul.f32 0.5, %v40_v15 }
  0x8e   :  { %v42_v17 = vsub.f32 1.5, %v41_v16 }
  0x90   :  { %v43_v18 = vmul.f32 %v73_v13, %v42_v17 }
  0x92   :  { %v47_v19 = vsel %vm46_vm4, %v73_v13, %v43_v18 }
  0x93   :  { %v48_v20 = vmul.f32 %v47_v19, %v23_v0 }
  0x95   :  { %49 = vst.msk [vmem:[#allocation5] sm:$0x3] %vm25_vm0, %v48_v20 }
  0x96   :  { %60 = dma.vmem_to_hbm [thread:$0]  %s56_s11, 32, %s58_s14, [#allocation4]  }
  0x97   :  { %124 = dma.done.wait [#allocation4], 32  }
  0x98   :  { %125 = vsyncadd [#allocation4], 4294967264 }
  0x99   :  { %65 = vsyncpa [#allocation3], 1 }
  0x9a   :  { %66 = vsyncpa [#allocation4], 1 }

</bundles_post_ra>
